<compile_context>
chip_gen: v7x
topology: tpu7x:2x2x1
jax: 0.10.0
libtpu: 0.0.40
codegen_flags: <defaults>
</compile_context>

<pallas_src>
import functools
import math

import numpy as np
import jax
import jax.numpy as jnp
from jax import lax
from jax.experimental import pallas as pl
from jax.experimental.pallas import tpu as pltpu


def _round_up(x, m):
    return ((x + m - 1) // m) * m


def _pick_tk(Kp, cap=3584):
    """Largest 128-multiple divisor of Kp that is <= cap (Kp itself if small)."""
    if Kp <= cap:
        return Kp
    for mult in range(cap // 128, 0, -1):
        tk = mult * 128
        if Kp % tk == 0:
            return tk
    return 128


# ---------------------------------------------------------------------------
# Pallas kernel 1: tiled matmul with int8 weights (dequantized in VMEM to
# bf16), bf16 activations, f32 accumulator, fused per-column affine (folded BN
# scale x int8 dequant scale, shift), optional ReLU, optional residual add.
# ---------------------------------------------------------------------------
def _mm_affine_kernel(a_ref, b_ref, s_ref, t_ref, o_ref, acc_ref, *, relu):
    @pl.when(pl.program_id(2) == 0)
    def _():
        acc_ref[...] = jnp.zeros_like(acc_ref)

    # int8 -> f32 -> bf16 (integer values <= 127 are exact in bf16)
    w = b_ref[...].astype(jnp.float32).astype(jnp.bfloat16)
    acc_ref[...] += jnp.dot(a_ref[...], w, preferred_element_type=jnp.float32)

    @pl.when(pl.program_id(2) == pl.num_programs(2) - 1)
    def _():
        y = acc_ref[...] * s_ref[...] + t_ref[...]
        if relu:
            y = jnp.maximum(y, 0.0)
        o_ref[...] = y.astype(o_ref.dtype)


def _mm_affine_res_kernel(a_ref, b_ref, s_ref, t_ref, r_ref, o_ref, acc_ref, *,
                          relu):
    @pl.when(pl.program_id(2) == 0)
    def _():
        acc_ref[...] = jnp.zeros_like(acc_ref)

    w = b_ref[...].astype(jnp.float32).astype(jnp.bfloat16)
    acc_ref[...] += jnp.dot(a_ref[...], w, preferred_element_type=jnp.float32)

    @pl.when(pl.program_id(2) == pl.num_programs(2) - 1)
    def _():
        y = acc_ref[...] * s_ref[...] + t_ref[...] + r_ref[...].astype(jnp.float32)
        if relu:
            y = jnp.maximum(y, 0.0)
        o_ref[...] = y.astype(o_ref.dtype)


def _prep_matmul_weight(wmat, scale=None, shift=None):
    """Pre-pad a (K, N) weight, quantize to per-column int8, fold the dequant
    scale into the per-column affine (build time)."""
    K, N = wmat.shape
    Kp = _round_up(K, 128)
    Np = _round_up(N, 128)
    if scale is None:
        scale = jnp.ones((N,), jnp.float32)
    if shift is None:
        shift = jnp.zeros((N,), jnp.float32)
    w = jnp.pad(wmat.astype(jnp.float32), ((0, Kp - K), (0, Np - N)))
    absmax = jnp.max(jnp.abs(w), axis=0)
    qscale = jnp.maximum(absmax, 1e-12) / 127.0
    w_q = jnp.clip(jnp.round(w / qscale), -127.0, 127.0).astype(jnp.int8)
    s_p = (jnp.pad(scale.astype(jnp.float32), (0, Np - N)) * qscale).reshape(1, Np)
    t_p = jnp.pad(shift.astype(jnp.float32), (0, Np - N)).reshape(1, Np)
    return {'w': w_q, 's': s_p, 't': t_p, 'K': K, 'N': N}


def matmul_prepared(a, p, relu=False, residual=None, out_dtype=jnp.bfloat16):
    """relu_opt((a @ dequant(W)) * scale + shift [+ residual]) with int8 weights."""
    M, K = a.shape
    assert K == p['K']
    N = p['N']
    b = p['w']
    Kp, Np = b.shape

    if a.dtype != jnp.bfloat16:
        a = a.astype(jnp.bfloat16)

    Mp = _round_up(M, 8)
    if Mp >= 256:
        tm = 256
        Mp = _round_up(Mp, 256)
    elif Mp >= 128:
        tm = 128
        Mp = _round_up(Mp, 128)
    else:
        tm = Mp
    # tn=256 only when Np >= 512 so small-M layers keep >= 2 parallel N tiles
    # (v7x: both TensorCores get work on the "parallel" axes).
    tn = 256 if (Np >= 512 and Np % 256 == 0) else 128
    tk = _pick_tk(Kp)

    a_p = a if (Mp == M and Kp == K) else jnp.pad(a, ((0, Mp - M), (0, Kp - K)))

    ins = [a_p, b, p['s'], p['t']]
    in_specs = [
        pl.BlockSpec((tm, tk), lambda i, j, k: (i, k)),
        pl.BlockSpec((tk, tn), lambda i, j, k: (k, j)),
        pl.BlockSpec((1, tn), lambda i, j, k: (0, j)),
        pl.BlockSpec((1, tn), lambda i, j, k: (0, j)),
    ]
    if residual is not None:
        r = residual
        if r.dtype != jnp.bfloat16:
            r = r.astype(jnp.bfloat16)
        if Mp != M or Np != N:
            r = jnp.pad(r, ((0, Mp - M), (0, Np - N)))
        ins.append(r)
        in_specs.append(pl.BlockSpec((tm, tn), lambda i, j, k: (i, j)))
        kernel = functools.partial(_mm_affine_res_kernel, relu=relu)
    else:
        kernel = functools.partial(_mm_affine_kernel, relu=relu)

    out = pl.pallas_call(
        kernel,
        out_shape=jax.ShapeDtypeStruct((Mp, Np), out_dtype),
        grid_spec=pltpu.PrefetchScalarGridSpec(
            num_scalar_prefetch=0,
            grid=(Mp // tm, Np // tn, Kp // tk),
            in_specs=in_specs,
            out_specs=pl.BlockSpec((tm, tn), lambda i, j, k: (i, j)),
            scratch_shapes=[pltpu.VMEM((tm, tn), jnp.float32)]),
        compiler_params=pltpu.CompilerParams(
            dimension_semantics=("parallel", "parallel", "arbitrary"),
            vmem_limit_bytes=32 * 1024 * 1024),
    )(*ins)
    return out[:M, :N]


# ---------------------------------------------------------------------------
# Pallas kernel 2: fully fused CBAM (channel attention MLP + channel mean/max
# + 7x7 spatial conv (as precomputed (HW,HW) matrices) + sigmoid + scaling).
# One kernel invocation per batch element; y never leaves VMEM.
# ---------------------------------------------------------------------------
def _cbam_kernel(x_ref, w1_ref, w2_ref, sa_ref, sm_ref, o_ref):
    x = x_ref[...][0].astype(jnp.float32)                 # (HW, C)

    ch_avg = jnp.mean(x, axis=0, keepdims=True)           # (1, C)
    ch_max = jnp.max(x, axis=0, keepdims=True)            # (1, C)

    def mlp(v):
        h = jnp.maximum(jnp.dot(v, w1_ref[...],
                                preferred_element_type=jnp.float32), 0.0)
        return jnp.dot(h, w2_ref[...], preferred_element_type=jnp.float32)

    att_c = jax.nn.sigmoid(mlp(ch_avg) + mlp(ch_max))     # (1, C)
    y = x * att_c                                          # (HW, C)

    sp_avg = jnp.mean(y, axis=1, keepdims=True)            # (HW, 1)
    sp_max = jnp.max(y, axis=1, keepdims=True)             # (HW, 1)
    att_s = (jnp.dot(sa_ref[...], sp_avg, preferred_element_type=jnp.float32) +
             jnp.dot(sm_ref[...], sp_max, preferred_element_type=jnp.float32))
    out = y * jax.nn.sigmoid(att_s)                        # (HW, C)
    o_ref[...] = out[None].astype(o_ref.dtype)


def cbam_forward(x, p):
    B, H, W, C = x.shape
    HW = H * W
    x_flat = x.reshape(B, HW, C)

    out = pl.pallas_call(
        _cbam_kernel,
        out_shape=jax.ShapeDtypeStruct((B, HW, C), jnp.bfloat16),
        grid_spec=pltpu.PrefetchScalarGridSpec(
            num_scalar_prefetch=0,
            grid=(B,),
            in_specs=[pl.BlockSpec((1, HW, C), lambda b: (b, 0, 0)),
                      pl.BlockSpec((C, 128), lambda b: (0, 0)),
                      pl.BlockSpec((128, C), lambda b: (0, 0)),
                      pl.BlockSpec((HW, HW), lambda b: (0, 0)),
                      pl.BlockSpec((HW, HW), lambda b: (0, 0))],
            out_specs=pl.BlockSpec((1, HW, C), lambda b: (b, 0, 0))),
        compiler_params=pltpu.CompilerParams(
            dimension_semantics=("parallel",),
            vmem_limit_bytes=32 * 1024 * 1024),
    )(x_flat, p['w1'], p['w2'], p['sa'], p['sm'])
    return out.reshape(B, H, W, C)


# ---------------------------------------------------------------------------
# Pallas kernel 3: fused ClassificationHead + GatingNetwork
# (global avg pool -> MLPs -> masked softmax).  bf16 weights, f32 accumulate.
# ---------------------------------------------------------------------------
def _heads_kernel(x_ref, wsh, bsh, wdr, bdr, wdme, bdme,
                  wg1, bg1, wg2, bg2, wg3, bg3,
                  dr_ref, dme_ref, gates_ref, *, num_tasks):
    x = x_ref[...].astype(jnp.float32)                     # (B, HW, C)
    pooled = jnp.mean(x, axis=1).astype(jnp.bfloat16)      # AdaptiveAvgPool2d(1)

    h = jnp.maximum(jnp.dot(pooled, wsh[...],
                            preferred_element_type=jnp.float32) + bsh[...], 0.0)
    hb = h.astype(jnp.bfloat16)
    dr_ref[...] = jnp.dot(hb, wdr[...],
                          preferred_element_type=jnp.float32) + bdr[...]
    dme_ref[...] = jnp.dot(hb, wdme[...],
                           preferred_element_type=jnp.float32) + bdme[...]

    g = jnp.maximum(jnp.dot(pooled, wg1[...],
                            preferred_element_type=jnp.float32) + bg1[...], 0.0)
    g = jnp.maximum(jnp.dot(g.astype(jnp.bfloat16), wg2[...],
                            preferred_element_type=jnp.float32) + bg2[...], 0.0)
    logit = jnp.dot(g.astype(jnp.bfloat16), wg3[...],
                    preferred_element_type=jnp.float32) + bg3[...]
    lane = lax.broadcasted_iota(jnp.int32, logit.shape, 1)
    logit = jnp.where(lane < num_tasks, logit, -jnp.inf)
    m = jnp.max(logit, axis=-1, keepdims=True)
    e = jnp.exp(logit - m)
    gates_ref[...] = e / jnp.sum(e, axis=-1, keepdims=True)


# ---------------------------------------------------------------------------
# Conv / pooling / upsampling wrappers built on the Pallas kernels
# ---------------------------------------------------------------------------
def conv2d(x, p, relu=False, residual=None, out_dtype=jnp.bfloat16):
    """NHWC conv with prepared (pre-padded int8) weights via im2col + matmul."""
    # TODO(synk): seg-decoder 3x3 convs would benefit from a direct-conv kernel
    # (the im2col patches there exceed the weight bytes they feed).
    B, H, W, Cin = x.shape
    kh, kw, stride, padding = p['kh'], p['kw'], p['stride'], p['padding']
    if padding:
        x = jnp.pad(x, ((0, 0), (padding, padding), (padding, padding), (0, 0)))
    Hp, Wp = x.shape[1], x.shape[2]
    Ho = (Hp - kh) // stride + 1
    Wo = (Wp - kw) // stride + 1

    if kh == 1 and kw == 1 and stride == 1:
        patches = x.reshape(B * Ho * Wo, Cin)
    else:
        cols = [x[:, dh:dh + stride * (Ho - 1) + 1:stride,
                  dw:dw + stride * (Wo - 1) + 1:stride, :]
                for dh in range(kh) for dw in range(kw)]
        patches = jnp.concatenate(cols, axis=-1).reshape(B * Ho * Wo, kh * kw * Cin)

    res2d = None if residual is None else residual.reshape(B * Ho * Wo, p['N'])
    y = matmul_prepared(patches, p, relu=relu, residual=res2d, out_dtype=out_dtype)
    return y.reshape(B, Ho, Wo, p['N'])


def conv_transpose2x2(x, p):
    """ConvTranspose2d(k=2, stride=2) == per-(dh,dw) matmul + spatial interleave."""
    B, H, W, Cin = x.shape
    Cout = p['N'] // 4
    y = matmul_prepared(x.reshape(B * H * W, Cin), p)
    y = y.reshape(B, H, W, 2, 2, Cout)
    return jnp.transpose(y, (0, 1, 3, 2, 4, 5)).reshape(B, 2 * H, 2 * W, Cout)


def maxpool_3x3_s2_p1(x):
    # Pairwise max over 9 shifted views (no 9x stacked HBM array, no extra kernel).
    B, H, W, C = x.shape
    xp = jnp.pad(x, ((0, 0), (1, 1), (1, 1), (0, 0)),
                 constant_values=float('-inf'))
    Ho = (H + 2 - 3) // 2 + 1
    Wo = (W + 2 - 3) // 2 + 1
    out = None
    for dh in range(3):
        for dw in range(3):
            sl = xp[:, dh:dh + 2 * (Ho - 1) + 1:2, dw:dw + 2 * (Wo - 1) + 1:2, :]
            out = sl if out is None else jnp.maximum(out, sl)
    return out


def _up_idx(n):
    # PyTorch bilinear, align_corners=False, scale factor 2
    dst = np.arange(2 * n)
    src = np.maximum((dst + 0.5) * 0.5 - 0.5, 0.0)
    i0 = np.minimum(np.floor(src).astype(np.int32), n - 1)
    frac = (src - np.floor(src)).astype(np.float32)
    i1 = np.minimum(i0 + 1, n - 1)
    return i0, i1, frac


def upsample2x_bilinear(x):
    """2x bilinear (align_corners=False) as an XLA gather + lerp on NHWC."""
    B, H, W, C = x.shape
    xf = x.astype(jnp.float32)
    i0, i1, f = _up_idx(H)
    f = jnp.asarray(f).reshape(1, 2 * H, 1, 1)
    xh = xf[:, i0, :, :] * (1.0 - f) + xf[:, i1, :, :] * f
    j0, j1, g = _up_idx(W)
    g = jnp.asarray(g).reshape(1, 1, 2 * W, 1)
    return xh[:, :, j0, :] * (1.0 - g) + xh[:, :, j1, :] * g


# ---------------------------------------------------------------------------
# Model pieces
# ---------------------------------------------------------------------------
def bottleneck_forward(x, p):
    # TODO(synk): fuse conv1/conv2/conv3 (+downsample) into one pallas_call with
    # the intermediate activations kept in VMEM to cut launch overhead.
    out = conv2d(x, p['conv1'], relu=True)
    out = conv2d(out, p['conv2'], relu=True)
    if 'down' in p:
        identity = conv2d(x, p['down'])
    else:
        identity = x
    # residual add + ReLU fused into the conv3 matmul epilogue
    return conv2d(out, p['conv3'], relu=True, residual=identity)


def backbone_forward(x, P):
    x = conv2d(x, P['conv1'], relu=True)
    x = maxpool_3x3_s2_p1(x)
    feats = {}
    for name in ('layer1', 'layer2', 'layer3', 'layer4'):
        for blk in P[name]:
            x = bottleneck_forward(x, blk)
        feats[name] = x
    return feats


def conv_block(x, p):
    x = conv2d(x, p['c1'], relu=True)
    return conv2d(x, p['c2'], relu=True)


def seg_forward(feats, P):
    x = conv_transpose2x2(feats['layer4'], P['up4'])
    x = jnp.concatenate([x, feats['layer3']], axis=-1)
    x = conv_block(x, P['conv4'])
    x = cbam_forward(x, P['cbam4'])
    x = conv_transpose2x2(x, P['up3'])
    x = jnp.concatenate([x, feats['layer2']], axis=-1)
    x = conv_block(x, P['conv3'])
    x = cbam_forward(x, P['cbam3'])
    x = conv_transpose2x2(x, P['up2'])
    x = jnp.concatenate([x, feats['layer1']], axis=-1)
    x = conv_block(x, P['conv2'])
    x = cbam_forward(x, P['cbam2'])
    x = conv_transpose2x2(x, P['up1'])
    x = conv_block(x, P['conv1'])
    # 1x1 final conv commuted before the bilinear upsample (both linear, acting
    # on disjoint axes -> identical result; 64->6 channels means the upsample
    # moves ~10x less data).
    x = conv2d(x, P['final'])
    x = upsample2x_bilinear(x)
    return x


def heads_forward(layer4, P):
    B, H, W, C = layer4.shape
    x = layer4.reshape(B, H * W, C)
    dr, dme, gates = pl.pallas_call(
        functools.partial(_heads_kernel, num_tasks=2),
        out_shape=(jax.ShapeDtypeStruct((B, 128), jnp.float32),
                   jax.ShapeDtypeStruct((B, 128), jnp.float32),
                   jax.ShapeDtypeStruct((B, 128), jnp.float32)),
    )(x, P['w_shared'], P['b_shared'],
      P['w_dr'], P['b_dr'], P['w_dme'], P['b_dme'],
      P['wg1'], P['bg1'], P['wg2'], P['bg2'], P['wg3'], P['bg3'])
    return dr[:, :P['n_dr']], dme[:, :P['n_dme']], gates[:, :2]


def multitask_forward(x_nchw, params, cfg):
    x = jnp.transpose(x_nchw, (0, 2, 3, 1)).astype(jnp.bfloat16)   # NCHW -> NHWC
    feats = backbone_forward(x, params['backbone'])
    dr, dme, gates = heads_forward(feats['layer4'], params['heads'])
    seg = seg_forward(feats, params['seg'])
    # The PyTorch module resizes seg_output if it differs from image_size; with
    # these shapes it already matches.
    assert seg.shape[1] == cfg.image_size
    return {
        'cls_output': {'dr_logits': dr, 'dme_logits': dme},
        'seg_output': jnp.transpose(seg, (0, 3, 1, 2)),
        'gates': gates,
        'features': {k: jnp.transpose(v, (0, 3, 1, 2)).astype(jnp.float32)
                     for k, v in feats.items()},
    }


# ---------------------------------------------------------------------------
# Deterministic parameter construction (shapes mirror the PyTorch module),
# with all matmul weights pre-laid-out / pre-padded / int8-quantized at build.
# ---------------------------------------------------------------------------
class KeyGen:
    def __init__(self, key):
        self._key = key

    def __call__(self):
        self._key, sub = jax.random.split(self._key)
        return sub


def _kaiming_conv(key, cout, cin, kh, kw):
    std = math.sqrt(2.0 / (cout * kh * kw))   # kaiming_normal_(fan_out, relu)
    return std * jax.random.normal(key, (cout, cin, kh, kw), jnp.float32)


def _linear(key, fin, fout):
    return (0.01 * jax.random.normal(key, (fin, fout), jnp.float32),
            jnp.zeros((fout,), jnp.float32))


def _bn_fold(c):
    # eval-mode BN with gamma=1, beta=0, running_mean=0, running_var=1, bias=0
    return (jnp.full((c,), 1.0 / math.sqrt(1.0 + 1e-5), jnp.float32),
            jnp.zeros((c,), jnp.float32))


def _ct_weight(key, cin, cout):
    std = math.sqrt(1.0 / (cin * 4))
    return std * jax.random.normal(key, (cin, cout, 2, 2), jnp.float32)


def prep_conv(w_oihw, scale=None, shift=None, stride=1, padding=0):
    Cout, Cin, kh, kw = w_oihw.shape
    if kh == 1 and kw == 1:
        wmat = w_oihw.reshape(Cout, Cin).T
    else:
        wmat = jnp.transpose(w_oihw, (2, 3, 1, 0)).reshape(kh * kw * Cin, Cout)
    d = _prep_matmul_weight(wmat, scale, shift)
    d.update({'kh': kh, 'kw': kw, 'stride': stride, 'padding': padding})
    return d


def prep_conv_transpose(w, b):
    Cin, Cout = w.shape[0], w.shape[1]
    wmat = jnp.transpose(w, (0, 2, 3, 1)).reshape(Cin, 4 * Cout)
    return _prep_matmul_weight(wmat, None, jnp.tile(b, 4))


def _pad_cols(w, n):
    return jnp.pad(w, ((0, 0), (0, n - w.shape[1])))


def _pad_row(b, n):
    return jnp.pad(b, (0, n - b.shape[0])).reshape(1, n)


def _conv_block_params(kg, cin, cout):
    return {'c1': prep_conv(_kaiming_conv(kg(), cout, cin, 3, 3), *_bn_fold(cout),
                            padding=1),
            'c2': prep_conv(_kaiming_conv(kg(), cout, cout, 3, 3), *_bn_fold(cout),
                            padding=1)}


def _spatial_conv_matrices(conv_oihw, H, W):
    """Unroll the 7x7, pad=3 spatial-attention conv into two (HW,HW) matrices
    (one for the channel-mean map, one for the channel-max map)."""
    wa = np.asarray(conv_oihw)[0, 0]   # (7, 7), acts on the mean map
    wm = np.asarray(conv_oihw)[0, 1]   # (7, 7), acts on the max map
    HW = H * W
    sa = np.zeros((HW, HW), np.float32)
    sm = np.zeros((HW, HW), np.float32)
    for h in range(H):
        for w in range(W):
            p = h * W + w
            for dh in range(7):
                hh = h + dh - 3
                if hh < 0 or hh >= H:
                    continue
                for dw in range(7):
                    ww = w + dw - 3
                    if ww < 0 or ww >= W:
                        continue
                    q = hh * W + ww
                    sa[p, q] += wa[dh, dw]
                    sm[p, q] += wm[dh, dw]
    return jnp.asarray(sa), jnp.asarray(sm)


def _cbam_params(kg, c, side, reduction=16):
    cr = c // reduction
    fc1 = _kaiming_conv(kg(), cr, c, 1, 1).reshape(cr, c)
    fc2 = _kaiming_conv(kg(), c, cr, 1, 1).reshape(c, cr)
    # zero-pad the reduced dim to 128 (exact no-op through ReLU + zero rows)
    w1 = jnp.pad(fc1.T, ((0, 0), (0, 128 - cr)))           # (C, 128)
    w2 = jnp.pad(fc2.T, ((0, 128 - cr), (0, 0)))           # (128, C)
    conv = _kaiming_conv(kg(), 1, 2, 7, 7)                  # (1, 2, 7, 7)
    sa, sm = _spatial_conv_matrices(conv, side, side)
    return {'w1': w1, 'w2': w2, 'sa': sa, 'sm': sm}


def build_params(kg, cfg):
    bn = _bn_fold
    bb = {'conv1': prep_conv(_kaiming_conv(kg(), 64, 3, 7, 7), *bn(64),
                             stride=2, padding=3)}
    layer_cfg = [('layer1', 64, 64, 256, 1, 3),
                 ('layer2', 256, 128, 512, 2, 4),
                 ('layer3', 512, 256, 1024, 2, 6),
                 ('layer4', 1024, 512, 2048, 2, 3)]
    for name, cin, mid, cout, stride, nblk in layer_cfg:
        blocks = []
        for bi in range(nblk):
            b_in = cin if bi == 0 else cout
            s = stride if bi == 0 else 1
            blk = {'conv1': prep_conv(_kaiming_conv(kg(), mid, b_in, 1, 1), *bn(mid)),
                   'conv2': prep_conv(_kaiming_conv(kg(), mid, mid, 3, 3), *bn(mid),
                                      stride=s, padding=1),
                   'conv3': prep_conv(_kaiming_conv(kg(), cout, mid, 1, 1), *bn(cout))}
            if bi == 0:
                blk['down'] = prep_conv(_kaiming_conv(kg(), cout, b_in, 1, 1),
                                        *bn(cout), stride=s)
            blocks.append(blk)
        bb[name] = blocks

    heads = {}
    w, b = _linear(kg(), 2048, 512)
    heads['w_shared'] = w.astype(jnp.bfloat16); heads['b_shared'] = b.reshape(1, -1)
    w, b = _linear(kg(), 512, cfg.num_classes_dr)
    heads['w_dr'] = _pad_cols(w, 128).astype(jnp.bfloat16)
    heads['b_dr'] = _pad_row(b, 128)
    w, b = _linear(kg(), 512, cfg.num_classes_dme)
    heads['w_dme'] = _pad_cols(w, 128).astype(jnp.bfloat16)
    heads['b_dme'] = _pad_row(b, 128)
    w, b = _linear(kg(), 2048, cfg.gating_hidden_dim)
    heads['wg1'] = w.astype(jnp.bfloat16); heads['bg1'] = b.reshape(1, -1)
    w, b = _linear(kg(), cfg.gating_hidden_dim, cfg.gating_hidden_dim)
    heads['wg2'] = w.astype(jnp.bfloat16); heads['bg2'] = b.reshape(1, -1)
    w, b = _linear(kg(), cfg.gating_hidden_dim, 2)
    heads['wg3'] = _pad_cols(w, 128).astype(jnp.bfloat16)
    heads['bg3'] = _pad_row(b, 128)
    heads['n_dr'] = cfg.num_classes_dr
    heads['n_dme'] = cfg.num_classes_dme

    s16 = cfg.image_size // 16
    s8 = cfg.image_size // 8
    s4 = cfg.image_size // 4
    seg = {}
    seg['up4'] = prep_conv_transpose(_ct_weight(kg(), 2048, 512),
                                     jnp.zeros((512,), jnp.float32))
    seg['conv4'] = _conv_block_params(kg, 512 + 1024, 512)
    seg['cbam4'] = _cbam_params(kg, 512, s16)
    seg['up3'] = prep_conv_transpose(_ct_weight(kg(), 512, 256),
                                     jnp.zeros((256,), jnp.float32))
    seg['conv3'] = _conv_block_params(kg, 256 + 512, 256)
    seg['cbam3'] = _cbam_params(kg, 256, s8)
    seg['up2'] = prep_conv_transpose(_ct_weight(kg(), 256, 128),
                                     jnp.zeros((128,), jnp.float32))
    seg['conv2'] = _conv_block_params(kg, 128 + 256, 128)
    seg['cbam2'] = _cbam_params(kg, 128, s4)
    seg['up1'] = prep_conv_transpose(_ct_weight(kg(), 128, 64),
                                     jnp.zeros((64,), jnp.float32))
    seg['conv1'] = _conv_block_params(kg, 64, 64)
    seg['final'] = prep_conv(_kaiming_conv(kg(), cfg.num_seg_classes, 64, 1, 1),
                             None, jnp.zeros((cfg.num_seg_classes,), jnp.float32))
    return {'backbone': bb, 'heads': heads, 'seg': seg}


class Config:
    pretrained = False
    gating_hidden_dim = 256
    num_classes_dr = 5
    num_classes_dme = 3
    dropout_rate = 0.3        # TODO(synk): dropout is identity (inference-mode kernel)
    num_seg_classes = 6
    image_size = 64


if __name__ == "__main__":
    cfg = Config()
    key = jax.random.PRNGKey(0)
    kparam, kdata = jax.random.split(key)
    params = build_params(KeyGen(kparam), cfg)
    x = jax.random.normal(kdata, (2, 3, cfg.image_size, cfg.image_size), jnp.float32)

    out = multitask_forward(x, params, cfg)
    out = jax.block_until_ready(out)

    assert out['cls_output']['dr_logits'].shape == (2, 5)
    assert out['cls_output']['dme_logits'].shape == (2, 3)
    assert out['gates'].shape == (2, 2)
    assert out['seg_output'].shape == (2, 6, cfg.image_size, cfg.image_size)
    assert out['features']['layer4'].shape == (2, 2048, 2, 2)
    assert bool(jnp.all(jnp.abs(jnp.sum(out['gates'], axis=1) - 1.0) < 1e-4))
    assert bool(jnp.all(jnp.isfinite(out['seg_output'])))
    print("KERNEL_OK")
</pallas_src>

<mosaic_0001>
module attributes {stable_mosaic.version = 11 : i64} {
  func.func @_mm_affine_kernel(%arg0: i32, %arg1: i32, %arg2: i32, %arg3: memref<256x256xbf16, #tpu.memory_space<vmem>>, %arg4: memref<256x128xi8, #tpu.memory_space<vmem>>, %arg5: memref<1x128xf32, #tpu.memory_space<vmem>>, %arg6: memref<1x128xf32, #tpu.memory_space<vmem>>, %arg7: memref<256x128xbf16, #tpu.memory_space<vmem>>, %arg8: memref<256x128xf32, #tpu.memory_space<vmem>>) attributes {dimension_semantics = [#tpu.dimension_semantics<parallel>, #tpu.dimension_semantics<parallel>, #tpu.dimension_semantics<arbitrary>], iteration_bounds = array<i64: 8, 1, 1>, scalar_prefetch = 0 : i64, scratch_operands = 1 : i64, tpu.core_type = #tpu.core_type<tc>, window_params = [{transform_indices = @transform_0, window_bounds = array<i64: 256, 256>}, {transform_indices = @transform_1, window_bounds = array<i64: 256, 128>}, {transform_indices = @transform_2, window_bounds = array<i64: 1, 128>}, {transform_indices = @transform_3, window_bounds = array<i64: 1, 128>}, {transform_indices = @transform_4, window_bounds = array<i64: 256, 128>}]} {
    %c0_i32 = arith.constant 0 : i32
    %0 = arith.cmpi eq, %arg2, %c0_i32 : i32
    %1 = arith.extui %0 : i1 to i32
    %c0_i32_0 = arith.constant 0 : i32
    %2 = arith.cmpi ne, %1, %c0_i32_0 : i32
    scf.if %2 {
      %cst_10 = arith.constant 0.000000e+00 : f32
      %14 = vector.broadcast %cst_10 : f32 to vector<256x128xf32>
      %c0_11 = arith.constant 0 : index
      %c0_12 = arith.constant 0 : index
      %15 = vector.load %arg8[%c0_11, %c0_12] : memref<256x128xf32, #tpu.memory_space<vmem>>, vector<256x128xf32>
      tpu.vector_store %arg8[%c0_11, %c0_12], %14 {strides = array<i32>} : memref<256x128xf32, #tpu.memory_space<vmem>>, vector<256x128xf32>,
    } else {
    }
    %c0 = arith.constant 0 : index
    %c0_1 = arith.constant 0 : index
    %3 = vector.load %arg4[%c0, %c0_1] : memref<256x128xi8, #tpu.memory_space<vmem>>, vector<256x128xi8>
    %4 = arith.sitofp %3 : vector<256x128xi8> to vector<256x128xf32>
    %5 = arith.truncf %4 : vector<256x128xf32> to vector<256x128xbf16>
    %c0_2 = arith.constant 0 : index
    %c0_3 = arith.constant 0 : index
    %6 = vector.load %arg8[%c0_2, %c0_3] : memref<256x128xf32, #tpu.memory_space<vmem>>, vector<256x128xf32>
    %c0_4 = arith.constant 0 : index
    %c0_5 = arith.constant 0 : index
    %7 = vector.load %arg3[%c0_4, %c0_5] : memref<256x256xbf16, #tpu.memory_space<vmem>>, vector<256x256xbf16>
    %cst = arith.constant dense<0.000000e+00> : vector<256x128xf32>
    %8 = tpu.matmul %7, %5, %cst {dimension_numbers = #tpu.dot_dimension_numbers<[1], [0], [0], [1], [0, 0, 1, 1], [], []>} : vector<256x256xbf16>, vector<256x128xbf16>, vector<256x128xf32> -> vector<256x128xf32>
    %9 = arith.addf %6, %8 : vector<256x128xf32>
    %c0_6 = arith.constant 0 : index
    %c0_7 = arith.constant 0 : index
    %10 = vector.load %arg8[%c0_6, %c0_7] : memref<256x128xf32, #tpu.memory_space<vmem>>, vector<256x128xf32>
    tpu.vector_store %arg8[%c0_6, %c0_7], %9 {strides = array<i32>} : memref<256x128xf32, #tpu.memory_space<vmem>>, vector<256x128xf32>,
    %c0_i32_8 = arith.constant 0 : i32
    %11 = arith.cmpi eq, %arg2, %c0_i32_8 : i32
    %12 = arith.extui %11 : i1 to i32
    %c0_i32_9 = arith.constant 0 : i32
    %13 = arith.cmpi ne, %12, %c0_i32_9 : i32
    scf.if %13 {
      %c0_10 = arith.constant 0 : index
      %c0_11 = arith.constant 0 : index
      %14 = vector.load %arg8[%c0_10, %c0_11] : memref<256x128xf32, #tpu.memory_space<vmem>>, vector<256x128xf32>
      %c0_12 = arith.constant 0 : index
      %c0_13 = arith.constant 0 : index
      %15 = vector.load %arg5[%c0_12, %c0_13] : memref<1x128xf32, #tpu.memory_space<vmem>>, vector<1x128xf32>
      %16 = vector.broadcast %15 : vector<1x128xf32> to vector<256x128xf32>
      %17 = arith.mulf %14, %16 : vector<256x128xf32>
      %c0_14 = arith.constant 0 : index
      %c0_15 = arith.constant 0 : index
      %18 = vector.load %arg6[%c0_14, %c0_15] : memref<1x128xf32, #tpu.memory_space<vmem>>, vector<1x128xf32>
      %19 = vector.broadcast %18 : vector<1x128xf32> to vector<256x128xf32>
      %20 = arith.addf %17, %19 : vector<256x128xf32>
      %cst_16 = arith.constant 0.000000e+00 : f32
      %21 = vector.broadcast %cst_16 : f32 to vector<256x128xf32>
      %22 = arith.maximumf %20, %21 : vector<256x128xf32>
      %23 = arith.truncf %22 : vector<256x128xf32> to vector<256x128xbf16>
      %c0_17 = arith.constant 0 : index
      %c0_18 = arith.constant 0 : index
      %24 = vector.load %arg7[%c0_17, %c0_18] : memref<256x128xbf16, #tpu.memory_space<vmem>>, vector<256x128xbf16>
      tpu.vector_store %arg7[%c0_17, %c0_18], %23 {strides = array<i32>} : memref<256x128xbf16, #tpu.memory_space<vmem>>, vector<256x128xbf16>,
    } else {
    }
    return
  }
  func.func @transform_0(%arg0: i32, %arg1: i32, %arg2: i32) -> (i32, i32) {
    %c0_i32 = arith.constant 0 : i32
    return %arg0, %arg2 : i32, i32
  }
  func.func @transform_1(%arg0: i32, %arg1: i32, %arg2: i32) -> (i32, i32) {
    %c0_i32 = arith.constant 0 : i32
    return %arg2, %arg1 : i32, i32
  }
  func.func @transform_2(%arg0: i32, %arg1: i32, %arg2: i32) -> (i32, i32) {
    %c0_i32 = arith.constant 0 : i32
    %c0_i32_0 = arith.constant 0 : i32
    return %c0_i32, %arg1 : i32, i32
  }
  func.func @transform_3(%arg0: i32, %arg1: i32, %arg2: i32) -> (i32, i32) {
    %c0_i32 = arith.constant 0 : i32
    %c0_i32_0 = arith.constant 0 : i32
    return %c0_i32, %arg1 : i32, i32
  }
  func.func @transform_4(%arg0: i32, %arg1: i32, %arg2: i32) -> (i32, i32) {
    %c0_i32 = arith.constant 0 : i32
    return %arg0, %arg1 : i32, i32
  }
}

</mosaic_0001>

<bundles_post_ra>
// kernel: tpu_custom_call.1
= control target key start
LH: loop header
LB: loop body
LE: loop exit
PB: predicated region body
PF: predicated region fallthrough
CT: control target
= control target key end

     0   :  { %9 = vsyncpa [#allocation4], 0  ;;  %s2255_s0 = inlined_call_operand.hbm [shape: bf16[2048,256], index: 0, kind: input, shape index: {}]   ;;  %s2256_s1 = inlined_call_operand.hbm [shape: s8[256,128], index: 1, kind: input, shape index: {}]   ;;  %s2257_s2 = inlined_call_operand.vmem [shape: f32[1,128], index: 2, kind: input, shape index: {}]   ;;  %s2258_s3 = inlined_call_operand.vmem [shape: f32[1,128], index: 3, kind: input, shape index: {}]   ;;  %s2259_s4 = inlined_call_operand.hbm [shape: bf16[2048,128], index: 4, kind: output, shape index: {}]  }
   0x1   :  { %11 = vsyncpa [#allocation4 + $0x1], 0 }
   0x2   :  { %12 = vsyncpa [#allocation7], 0 }
   0x3   :  { %13 = vsyncpa [#allocation5], 0 }
   0x4   :  { %15 = vsyncpa [#allocation5 + $0x1], 0  ;;  %s1904_s15 = smov 0   ;;  %s1906_s16 = smov 0  }
   0x5   :  { %s1908_s17 = smov 0   ;;  %s1910_s18 = smov 0  }
   0x6   :  { %s1912_s19 = smov 0   ;;  %s1914_s20 = smov 0  }
   0x7 LB: > { %s1257_s21 = sadd.s32 4294967295, %s1870_s20   ;;  %s1258_s22 = sadd.s32 4294967294, %s1870_s20   ;;  %s1870_s20 = sphi %s1914_s20, %s21_s20   ;;  %s1866_s19 = sphi %s1912_s19, %s2282_s19   ;;  %s1862_s18 = sphi %s1910_s18, %s2281_s18   ;;  %s1858_s17 = sphi %s1908_s17, %s2280_s17   ;;  %s1854_s16 = sphi %s1906_s16, %s2279_s16   ;;  %s1850_s15 = sphi %s1904_s15, %s2278_s15  }
   0x8   : > { %p62_p0 = scmp.ne.s32.totalorder %s1854_s16, %s1850_s15  ;;  %p1938_p1 = scmp.eq.s32.totalorder %s1257_s21, 0 }
   0x9   : > { %p1942_p2 = scmp.eq.s32.totalorder %s1257_s21, 7  ;;  %p174_p3 = scmp.eq.s32.totalorder %s1258_s22, 7 }
   0xa   : > { %s2264_s23 = scalar_select %p1938_p1, 1, 0 }
   0xb   : > { %s2265_s24 = scalar_select %p1942_p2, 1, 0 }
   0xc   : > { %p1948_p4 = por %p1938_p1, %p62_p0  ;;  %p1259_p5 = scmp.ge.s32.totalorder %s1870_s20, 1 }
   0xd   : > { %p1953_p6 = por %p174_p3, %p62_p0  ;;  %p181_p7 = scmp.lt.s32.totalorder %s1870_s20, 9 }
   0xe   : > { %s2266_s25 = scalar_select %p1948_p4, 1, 0 }
   0xf   : > { %s2267_s26 = scalar_select %p1953_p6, 1, 0 }
  0x10   : > { %p1958_p8 = pnand %p1259_p5, %p181_p7  ;;  %s1872_s28 = smov [#allocation6]  }
  0x11   : > { %s197_s29 = sshll.u32 %s1872_s28, 4  ;;  %s40_s5 = sadd.s32 1, %s1866_s19  ;;  %s198_s29 = int_to_ptr.vmem [resolvable:$true] %s197_s29 }
  0x12   : > { %s2268_s27 = scalar_select %p1958_p8, 1, 0 }
  0x13   : > { %p1609_p9 = pneg %p1958_p8  ;;  %s1726_s8 = scalar_lea.hbm %s2256_s1, 1024 }
  0x14   : > { %p1727_p11 = scmp.ne.s32.totalorder %s2256_s1, %s1726_s8  ;;  %p1733_p3 = scmp.lt.u32.totalorder %s1726_s8, %s2256_s1 }
  0x15   : > { %p1966_p10 = pnand %p1609_p9, %p1938_p1 }
  0x17   : > { %p1728_p12 = pneg %p1966_p10 }
  0x19   : > { %p1729_p13 = pnand %p1728_p12, %p1727_p11 }
  0x1b   : > { %p1730_p0 = pneg %p1729_p13 }
  0x1d   : > { %p1735_p5 = pnand %p1733_p3, %p1730_p0 }
  0x1f   : > { %1738 = shalt.err (!%p1735_p5)
}
  0x20   : > { %s1739_s13 = scalar_lea.vmem %s198_s29, 1024  ;;  %p1747_p1 = scmp.lt.s32.totalorder %s198_s29, %s198_s29 }
  0x21   : > { %p1740_p7 = scmp.ne.s32.totalorder %s198_s29, %s1739_s13  ;;  %p1748_p4 = scmp.lt.s32.totalorder %s1739_s13, %s1739_s13 }
  0x23   : > { %p1742_p9 = pnand %p1740_p7, %p1728_p12  ;;  %p1749_p8 = por %p1748_p4, %p1747_p1 }
  0x25   : > { %p1743_p6 = pneg %p1742_p9 }
  0x27   : > { %p1750_p2 = pnand %p1749_p8, %p1743_p6 }
  0x29   : > { %1753 = shalt.err (!%p1750_p2)
}
  0x2a   : > { %s1873_s14 = smov 128   ;;  %s1874_s21 = smov 8  }
  0x2b   : > { %1612 = dma.hbm_to_vmem [thread:$0]  (!%p1966_p10), %s2256_s1, 1024, %s198_s29, [#allocation7], %s1873_s14, %s1873_s14, %s1874_s21  }
  0x2c   : > { %p42_p1 = scmp.ge.s32.totalorder %s40_s5, 8  ;;  %s49_s6 = sadd.s32 1, %s1858_s17 }
  0x2d   : > { %p56_p2 = scmp.ne.s32.totalorder %s1858_s17, %s1854_s16  ;;  %p57_p4 = scmp.eq.s32.totalorder %s1870_s20, 0 }
  0x2e   : > { %s2284_s5 = smov (%p42_p1, %s40_s5), 0  ;;  %p2271_p8 = scmp.ne.s32.totalorder %s2265_s24, 0 }
  0x2f   : > { %p1996_p6 = por %p57_p4, %p56_p2  ;;  %s44_s8 = ssub.s32 %s1866_s19, %s2284_s5 }
  0x30   : > { %p2002_p11 = por %p2271_p8, %p56_p2  ;;  %p1622_p12 = scmp.lt.s32.totalorder %s1870_s20, 8 }
  0x31   : > { %p47_p10 = scmp.eq.s32.totalorder %s44_s8, 0  ;;  %s223_s29 = sand.u32 1, %s1858_s17  }
  0x32   : > { %s1264_s9 = sshll.u32 %s223_s29, 8  ;;  %s1344_s11 = sshll.u32 %s1866_s19, 12 }
  0x33   : > { %s2011_s10 = scalar_select %p47_p10, %s1858_s17, %s49_s6  }
  0x34   : > { %s2017_s22 = scalar_lea.hbm %s2255_s0, %s1344_s11  ;;  %s227_s24 = scalar_lea.vmem [#allocation3], %s1264_s9 }
  0x35   : > { %s237_s28 = sshll.u32 %s227_s24, 4  ;;  %p2023_p13 = pnand %p1622_p12, %p1996_p6  ;;  %s2019_s28 = int_to_ptr.vmem [resolvable:$true] %s237_s28 }
  0x36   : > { %s2027_s6 = scalar_lea.sflag [#allocation4], %s223_s29  ;;  %s1754_s12 = scalar_lea.hbm %s2017_s22, 4096 }
  0x37   : > { %p1755_p0 = scmp.ne.s32.totalorder %s2017_s22, %s1754_s12  ;;  %p1756_p3 = pneg %p2023_p13 }
  0x38   : > { %s1759_s7 = scalar_lea.hbm %s2255_s0, 32768  ;;  %p1760_p9 = scmp.lt.u32.totalorder %s2017_s22, %s2255_s0 }
  0x39   : > { %p1757_p5 = pnand %p1756_p3, %p1755_p0  ;;  %p1761_p1 = scmp.lt.u32.totalorder %s1759_s7, %s1754_s12 }
  0x3a   : > { %p1763_p4 = scmp.lt.u32.totalorder %s1754_s12, %s2017_s22 }
  0x3b   : > { %p1758_p7 = pneg %p1757_p5  ;;  %p1762_p2 = por %p1761_p1, %p1760_p9 }
  0x3d   : > { %p1764_p6 = por %p1763_p4, %p1762_p2 }
  0x3f   : > { %p1765_p8 = pnand %p1764_p6, %p1758_p7 }
  0x41   : > { %1768 = shalt.err (!%p1765_p8)
}
  0x42   : > { %s1769_s29 = scalar_lea.vmem %s2019_s28, 4096  ;;  %s1875_s9 = smov [#allocation3]  }
  0x43   : > { %p1770_p12 = scmp.ne.s32.totalorder %s2019_s28, %s1769_s29  ;;  %s1774_s11 = sshll.u32 %s1875_s9, 4  ;;  %s1775_s11 = int_to_ptr.vmem [resolvable:$false] %s1774_s11 }
  0x44   : > { %s1776_s13 = scalar_lea.vmem %s1775_s11, 8192  ;;  %p1777_p5 = scmp.lt.s32.totalorder %s2019_s28, %s1775_s11 }
  0x45   : > { %p1772_p10 = pnand %p1770_p12, %p1756_p3  ;;  %p1778_p9 = scmp.lt.s32.totalorder %s1776_s13, %s1769_s29 }
  0x47   : > { %p1773_p0 = pneg %p1772_p10  ;;  %p1779_p1 = por %p1778_p9, %p1777_p5 }
  0x49   : > { %p1780_p2 = pnand %p1779_p1, %p1773_p0 }
  0x4b   : > { %1783 = shalt.err (!%p1780_p2)
}
  0x4c   : > { %1616 = dma.hbm_to_vmem [thread:$0]  (!%p2023_p13), %s2017_s22, 4096, %s2019_s28, %s2027_s6, %s1873_s14, %s1873_s14, %s1874_s21  }
  0x4d   : > { %p2274_p3 = scmp.ne.s32.totalorder %s2268_s27, 0 }
  0x4e   : > { %s2061_s12 = sand.u32 (!%p2274_p3), 1, %s1854_s16   ;;  %p2275_p7 = scmp.ne.s32.totalorder (!%p2274_p3), %s2266_s25, 0 }
  0x4f   : > { %249 = sbr.rel (%p2274_p3) target bundleno = 422 (0x1a6), region = 36  ;;  %s1269_s7 = sshll.u32 (!%p2274_p3), %s2061_s12, 8 }
  0x50   : > { %s252_s24 = scalar_lea.sflag (!%p2274_p3), [#allocation4], %s2061_s12  ;;  %s2065_s29 = scalar_lea.vmem (!%p2274_p3), [#allocation3], %s1269_s7 }
  0x56   : > { %1837 = dma.done.wait (%p2275_p7), %s252_s24, 4096  }
  0x57   : > { %1839 = vsyncadd (%p2275_p7), %s252_s24, 4294963200  ;;  %p2276_p13 = scmp.ne.s32.totalorder %s2264_s23, 0 }
  0x59   : > { %1841 = dma.done.wait (%p2276_p13), [#allocation7], 1024  }
  0x5a   : > { %1843 = vsyncadd (%p2276_p13), [#allocation7], 4294966272  ;;  %v341_v0 = vld [vmem:[#allocation6 + $0x20] sm:$0xff]  ;;  %v342_v5 = vld [vmem:[#allocation6 + $0x28] sm:$0xff]  ;;  %s1271_s21 = sshll.u32 %s2061_s12, 7  ;;  %s1377_s28 = sshll.u32 %s1862_s18, 11 }
  0x5b   : > { %v337_v1 = vld [vmem:[#allocation6] sm:$0xff]  ;;  %v353_v2 = vunpack.c.l.s8.bf16 %v341_v0  ;;  %v354_v3 = vunpack.c.h.s8.bf16 %v341_v0  ;;  %v338_v8 = vld [vmem:[#allocation6 + $0x8] sm:$0xff]  ;;  %v355_v9 = vunpack.c.l.s8.bf16 %v342_v5  ;;  %v356_v12 = vunpack.c.h.s8.bf16 %v342_v5  ;;  %v343_v13 = vld [vmem:[#allocation6 + $0x30] sm:$0xff]  ;;  %s2128_s22 = scalar_lea.vmem [#allocation8], %s1271_s21  ;;  %s2203_s11 = scalar_lea.hbm %s2259_s4, %s1377_s28 }
  0x5c   : > { %v345_v4 = vunpack.c.l.s8.bf16 %v337_v1  ;;  %v1680_v6 = vld [vmem:[%s2065_s29 + $0x4] ss:$8 sps:$4 sm:$0xff]   ;;  %v346_v7 = vunpack.c.h.s8.bf16 %v337_v1  ;;  %v347_v11 = vunpack.c.l.s8.bf16 %v338_v8  ;;  %v348_v14 = vunpack.c.h.s8.bf16 %v338_v8  ;;  %v339_v16 = vld [vmem:[#allocation6 + $0x10] sm:$0xff]  ;;  %v344_v19 = vld [vmem:[#allocation6 + $0x38] sm:$0xff]  ;;  %s1130_s8 = sshll.u32 %s2128_s22, 4  ;;  %s1116_s18 = scalar_lea.sflag [#allocation5], %s2061_s12  ;;  %s2205_s8 = int_to_ptr.vmem [resolvable:$true] %s1130_s8 }
  0x5d   : > { %1473 = vmatprep.subr.bf16.mxu0 %v353_v2  ;;  %1585 = vmatprep.subr.bf16.mxu1 %v353_v2  ;;  %v1683_v10 = vld [vmem:[%s2065_s29 + $0x84] ss:$8 sps:$4 sm:$0xff]   ;;  %v357_v15 = vunpack.c.l.s8.bf16 %v343_v13  ;;  %v349_v17 = vunpack.c.l.s8.bf16 %v339_v16  ;;  %v358_v18 = vunpack.c.h.s8.bf16 %v343_v13  ;;  %v350_v20 = vunpack.c.h.s8.bf16 %v339_v16  ;;  %v340_v22 = vld [vmem:[#allocation6 + $0x18] sm:$0xff]  ;;  %v1678_v26 = vld [vmem:[%s2065_s29] ss:$8 sps:$4 sm:$0xff]   ;;  %s1784_s13 = scalar_lea.vmem %s2205_s8, 2048 }
  0x5e   : > { %1474 = vmatpush3.bf16.msra.mxu0 %v345_v4  ;;  %1593 = vmatpush3.bf16.msra.mxu1 %v345_v4  ;;  %v359_v21 = vunpack.c.l.s8.bf16 %v344_v19  ;;  %v351_v23 = vunpack.c.l.s8.bf16 %v340_v22  ;;  %v360_v24 = vunpack.c.h.s8.bf16 %v344_v19  ;;  %v352_v25 = vunpack.c.h.s8.bf16 %v340_v22  ;;  %v1681_v27 = vld [vmem:[%s2065_s29 + $0x80] ss:$8 sps:$4 sm:$0xff]   ;;  %v1684_v28 = vld [vmem:[%s2065_s29 + $0x14] ss:$8 sps:$4 sm:$0xff]   ;;  %v1688_v30 = vld [vmem:[%s2065_s29 + $0x10] ss:$8 sps:$4 sm:$0xff]   ;;  %p1785_p4 = scmp.ne.s32.totalorder %s2205_s8, %s1784_s13 }
  0x5f   : > { %1475 = vmatprep.subr.bf16.mxu0 %v354_v3  ;;  %1586 = vmatprep.subr.bf16.mxu1 %v354_v3  ;;  %v1686_v29 = vld [vmem:[%s2065_s29 + $0x94] ss:$8 sps:$4 sm:$0xff]   ;;  %v1689_v31 = vld [vmem:[%s2065_s29 + $0x90] ss:$8 sps:$4 sm:$0xff]   ;;  %v1690_v32 = vld [vmem:[%s2065_s29 + $0x24] ss:$8 sps:$4 sm:$0xff]  }
  0x60   : > { %617 = vmatprep.mubr.bf16.mxu0 %v1680_v6  ;;  %681 = vmatprep.mubr.bf16.mxu1 %v1683_v10  ;;  %v1692_v33 = vld [vmem:[%s2065_s29 + $0xa4] ss:$8 sps:$4 sm:$0xff]   ;;  %v1694_v34 = vld [vmem:[%s2065_s29 + $0x20] ss:$8 sps:$4 sm:$0xff]   ;;  %v1696_v36 = vld [vmem:[%s2065_s29 + $0x34] ss:$8 sps:$4 sm:$0xff]   ;;  %p1786_p6 = pnand %p1785_p4, %p2002_p11 }
  0x61   : > { %v1695_v35 = vld [vmem:[%s2065_s29 + $0xa0] ss:$8 sps:$4 sm:$0xff]   ;;  %v1698_v37 = vld [vmem:[%s2065_s29 + $0xb4] ss:$8 sps:$4 sm:$0xff]   ;;  %v1700_v38 = vld [vmem:[%s2065_s29 + $0x30] ss:$8 sps:$4 sm:$0xff]  }
  0x62   : > { %1476 = vmatpush3.bf16.msra.mxu0 %v346_v7  ;;  %1594 = vmatpush3.bf16.msra.mxu1 %v346_v7  ;;  %v1701_v39 = vld [vmem:[%s2065_s29 + $0xb0] ss:$8 sps:$4 sm:$0xff]   ;;  %v1702_v40 = vld [vmem:[%s2065_s29 + $0x44] ss:$8 sps:$4 sm:$0xff]   ;;  %v1706_v42 = vld [vmem:[%s2065_s29 + $0x40] ss:$8 sps:$4 sm:$0xff]   ;;  %p1787_p8 = pneg %p1786_p6 }
  0x63   : > { %1477 = vmatprep.subr.bf16.mxu0 %v355_v9  ;;  %1587 = vmatprep.subr.bf16.mxu1 %v355_v9  ;;  %v1704_v41 = vld [vmem:[%s2065_s29 + $0xc4] ss:$8 sps:$4 sm:$0xff]   ;;  %v1707_v43 = vld [vmem:[%s2065_s29 + $0xc0] ss:$8 sps:$4 sm:$0xff]   ;;  %v1708_v44 = vld [vmem:[%s2065_s29 + $0x54] ss:$8 sps:$4 sm:$0xff]  }
  0x64   : > { %v1710_v45 = vld [vmem:[%s2065_s29 + $0xd4] ss:$8 sps:$4 sm:$0xff]   ;;  %v1712_v46 = vld [vmem:[%s2065_s29 + $0x50] ss:$8 sps:$4 sm:$0xff]   ;;  %v1714_v48 = vld [vmem:[%s2065_s29 + $0x64] ss:$8 sps:$4 sm:$0xff]  }
  0x65   : > { %v1713_v47 = vld [vmem:[%s2065_s29 + $0xd0] ss:$8 sps:$4 sm:$0xff]   ;;  %v1716_v49 = vld [vmem:[%s2065_s29 + $0xe4] ss:$8 sps:$4 sm:$0xff]   ;;  %v1718_v50 = vld [vmem:[%s2065_s29 + $0x60] ss:$8 sps:$4 sm:$0xff]  }
  0x66   : > { %1478 = vmatpush3.bf16.msra.mxu0 %v347_v11  ;;  %1595 = vmatpush3.bf16.msra.mxu1 %v347_v11  ;;  %v1719_v51 = vld [vmem:[%s2065_s29 + $0xe0] ss:$8 sps:$4 sm:$0xff]   ;;  %v1720_v52 = vld [vmem:[%s2065_s29 + $0x74] ss:$8 sps:$4 sm:$0xff]   ;;  %v1724_v54 = vld [vmem:[%s2065_s29 + $0x70] ss:$8 sps:$4 sm:$0xff]  }
  0x67   : > { %1479 = vmatprep.subr.bf16.mxu0 %v356_v12  ;;  %1588 = vmatprep.subr.bf16.mxu1 %v356_v12  ;;  %v1722_v53 = vld [vmem:[%s2065_s29 + $0xf4] ss:$8 sps:$4 sm:$0xff]   ;;  %v1725_v55 = vld [vmem:[%s2065_s29 + $0xf0] ss:$8 sps:$4 sm:$0xff]   ;;  %v2110_v59 = vld [vmem:[%s2257_s2] ss:$0 sm:$0xff] }
  0x68   : > { %v2115_v1 = vld [vmem:[%s2258_s3] ss:$0 sm:$0xff]  ;;  %s1876_s7 = smov [#allocation8]  }
  0x69   : > { %s1788_s24 = sshll.u32 %s1876_s7, 4  ;;  %s1789_s24 = int_to_ptr.vmem [resolvable:$false] %s1788_s24 }
  0x6a   : > { %1480 = vmatpush3.bf16.msra.mxu0 %v348_v14  ;;  %1596 = vmatpush3.bf16.msra.mxu1 %v348_v14  ;;  %s1790_s29 = scalar_lea.vmem %s1789_s24, 4096  ;;  %p1791_p12 = scmp.lt.s32.totalorder %s2205_s8, %s1789_s24 }
  0x6b   : > { %1481 = vmatprep.subr.bf16.mxu0 %v357_v15  ;;  %1589 = vmatprep.subr.bf16.mxu1 %v357_v15  ;;  %p1792_p10 = scmp.lt.s32.totalorder %s1790_s29, %s1784_s13 }
  0x6d   : > { %p1793_p0 = por %p1792_p10, %p1791_p12 }
  0x6e   : > { %1482 = vmatpush3.bf16.msra.mxu0 %v349_v17  ;;  %1597 = vmatpush3.bf16.msra.mxu1 %v349_v17 }
  0x6f   : > { %1483 = vmatprep.subr.bf16.mxu0 %v358_v18  ;;  %1590 = vmatprep.subr.bf16.mxu1 %v358_v18  ;;  %p1794_p5 = pnand %p1793_p0, %p1787_p8 }
  0x72   : > { %1484 = vmatpush3.bf16.msra.mxu0 %v350_v20  ;;  %1598 = vmatpush3.bf16.msra.mxu1 %v350_v20 }
  0x73   : > { %1485 = vmatprep.subr.bf16.mxu0 %v359_v21  ;;  %1591 = vmatprep.subr.bf16.mxu1 %v359_v21 }
  0x76   : > { %1486 = vmatpush3.bf16.msra.mxu0 %v351_v23  ;;  %1599 = vmatpush3.bf16.msra.mxu1 %v351_v23 }
  0x77   : > { %1487 = vmatprep.subr.bf16.mxu0 %v360_v24  ;;  %1592 = vmatprep.subr.bf16.mxu1 %v360_v24 }
  0x7a   : > { %1488 = vmatpush3.bf16.msra.mxu0 %v352_v25  ;;  %1600 = vmatpush3.bf16.msra.mxu1 %v352_v25 }
  0x7d   : > { %618 = vmatmul.mubr.bf16.vlgmr.msra.gmra.mrb[0].mxu0 %v1678_v26  ;;  %682 = vmatmul.mubr.bf16.vlgmr.msra.gmra.mrb[0].mxu1 %v1681_v27 }
  0x7e   : > { %625 = vmatprep.mubr.bf16.mxu0 %v1684_v28  ;;  %689 = vmatprep.mubr.bf16.mxu1 %v1686_v29 }
  0x85   : > { %626 = vmatmul.mubr.bf16.gmra.mrb[4].mxu0 %v1688_v30  ;;  %690 = vmatmul.mubr.bf16.gmra.mrb[4].mxu1 %v1689_v31 }
  0x86   : > { %633 = vmatprep.mubr.bf16.mxu0 %v1690_v32  ;;  %697 = vmatprep.mubr.bf16.mxu1 %v1692_v33 }
  0x8d   : > { %634 = vmatmul.mubr.bf16.gmra.mrb[8].mxu0 %v1694_v34  ;;  %698 = vmatmul.mubr.bf16.gmra.mrb[8].mxu1 %v1695_v35 }
  0x8e   : > { %641 = vmatprep.mubr.bf16.mxu0 %v1696_v36  ;;  %705 = vmatprep.mubr.bf16.mxu1 %v1698_v37 }
  0x95   : > { %642 = vmatmul.mubr.bf16.gmra.mrb[12].mxu0 %v1700_v38  ;;  %706 = vmatmul.mubr.bf16.gmra.mrb[12].mxu1 %v1701_v39 }
  0x96   : > { %649 = vmatprep.mubr.bf16.mxu0 %v1702_v40  ;;  %713 = vmatprep.mubr.bf16.mxu1 %v1704_v41 }
  0x9d   : > { %650 = vmatmul.mubr.bf16.gmra.mrb[16].mxu0 %v1706_v42  ;;  %714 = vmatmul.mubr.bf16.gmra.mrb[16].mxu1 %v1707_v43 }
  0x9e   : > { %657 = vmatprep.mubr.bf16.mxu0 %v1708_v44  ;;  %721 = vmatprep.mubr.bf16.mxu1 %v1710_v45 }
  0xa5   : > { %658 = vmatmul.mubr.bf16.gmra.mrb[20].mxu0 %v1712_v46  ;;  %722 = vmatmul.mubr.bf16.gmra.mrb[20].mxu1 %v1713_v47 }
  0xa6   : > { %665 = vmatprep.mubr.bf16.mxu0 %v1714_v48  ;;  %729 = vmatprep.mubr.bf16.mxu1 %v1716_v49 }
  0xad   : > { %666 = vmatmul.mubr.bf16.gmra.mrb[24].mxu0 %v1718_v50  ;;  %730 = vmatmul.mubr.bf16.gmra.mrb[24].mxu1 %v1719_v51 }
  0xae   : > { %673 = vmatprep.mubr.bf16.mxu0 %v1720_v52  ;;  %737 = vmatprep.mubr.bf16.mxu1 %v1722_v53 }
  0xb5   : > { %674 = vmatmul.mubr.bf16.gmra.mrb[28].mxu0 %v1724_v54  ;;  %738 = vmatmul.mubr.bf16.gmra.mrb[28].mxu1 %v1725_v55 }
 0x150   : > { %v1489_v56 = vpop.f32.mrb[0].mxu0  ;;  %v1537_v57 = vpop.f32.mrb[0].mxu1 }
 0x151   : > { %v1490_v58 = vpop.f32.mrb[1].mxu0  ;;  %v1538_v60 = vpop.f32.mrb[1].mxu1 }
 0x152   : > { %v1491_v61 = vadd.f32 %v1490_v58, %v1489_v56  ;;  %v1539_v62 = vadd.f32 %v1538_v60, %v1537_v57  ;;  %v1492_v63 = vpop.f32.mrb[2].mxu0  ;;  %v1540_v0 = vpop.f32.mrb[2].mxu1 }
 0x153   : > { %v1493_v2 = vpop.f32.mrb[3].mxu0  ;;  %v1541_v3 = vpop.f32.mrb[3].mxu1 }
 0x154   : > { %v852_v4 = vmul.f32 %v1491_v61, %v2110_v59  ;;  %v868_v5 = vmul.f32 %v1539_v62, %v2110_v59  ;;  %v1494_v6 = vadd.f32 %v1493_v2, %v1492_v63  ;;  %v1542_v7 = vadd.f32 %v1541_v3, %v1540_v0 }
 0x156   : > { %v891_v8 = vadd.f32 %v2115_v1, %v852_v4  ;;  %v907_v9 = vadd.f32 %v2115_v1, %v868_v5  ;;  %v853_v10 = vmul.f32 %v1494_v6, %v2110_v59  ;;  %v869_v11 = vmul.f32 %v1542_v7, %v2110_v59 }
 0x158   : > { %v892_v12 = vadd.f32 %v2115_v1, %v853_v10  ;;  %v908_v13 = vadd.f32 %v2115_v1, %v869_v11  ;;  %v1495_v14 = vpop.f32.mrb[4].mxu0  ;;  %v1543_v15 = vpop.f32.mrb[4].mxu1  ;;  %v923_v16 = vmax.f32 %v891_v8, 0.0  ;;  %v939_v17 = vmax.f32 %v907_v9, 0.0 }
 0x159   : > { %v1496_v18 = vpop.f32.mrb[5].mxu0  ;;  %v1544_v19 = vpop.f32.mrb[5].mxu1 }
 0x15a   : > { %v924_v20 = vmax.f32 %v892_v12, 0.0  ;;  %v940_v21 = vmax.f32 %v908_v13, 0.0  ;;  %v1497_v22 = vadd.f32 %v1496_v18, %v1495_v14  ;;  %v1545_v23 = vadd.f32 %v1544_v19, %v1543_v15  ;;  %v1498_v24 = vpop.f32.mrb[6].mxu0  ;;  %v1546_v25 = vpop.f32.mrb[6].mxu1 }
 0x15b   : > { %v1499_v26 = vpop.f32.mrb[7].mxu0  ;;  %v1547_v27 = vpop.f32.mrb[7].mxu1 }
 0x15c   : > { %v1381_v28 = vpack.c.bf16 %v924_v20, %v923_v16  ;;  %v1421_v29 = vpack.c.bf16 %v940_v21, %v939_v17  ;;  %v854_v30 = vmul.f32 %v1497_v22, %v2110_v59  ;;  %v870_v31 = vmul.f32 %v1545_v23, %v2110_v59 }
 0x15d   : > { %v1500_v32 = vadd.f32 %v1499_v26, %v1498_v24  ;;  %v1548_v33 = vadd.f32 %v1547_v27, %v1546_v25 }
 0x15e   : > { %1382 = vst [vmem:[%s2128_s22] sm:$0xff] %v1381_v28   ;;  %1465 = vst [vmem:[%s2128_s22 + $0x40] sm:$0xff] %v1421_v29   ;;  %v893_v34 = vadd.f32 %v2115_v1, %v854_v30  ;;  %v909_v35 = vadd.f32 %v2115_v1, %v870_v31 }
 0x15f   : > { %v855_v36 = vmul.f32 %v1500_v32, %v2110_v59  ;;  %v871_v37 = vmul.f32 %v1548_v33, %v2110_v59 }
 0x160   : > { %v1501_v38 = vpop.f32.mrb[8].mxu0  ;;  %v1549_v39 = vpop.f32.mrb[8].mxu1  ;;  %v925_v48 = vmax.f32 %v893_v34, 0.0  ;;  %v941_v49 = vmax.f32 %v909_v35, 0.0 }
 0x161   : > { %v894_v40 = vadd.f32 %v2115_v1, %v855_v36  ;;  %v910_v41 = vadd.f32 %v2115_v1, %v871_v37  ;;  %v1502_v42 = vpop.f32.mrb[9].mxu0  ;;  %v1550_v43 = vpop.f32.mrb[9].mxu1 }
 0x162   : > { %v1503_v44 = vadd.f32 %v1502_v42, %v1501_v38  ;;  %v1551_v45 = vadd.f32 %v1550_v43, %v1549_v39  ;;  %v1504_v46 = vpop.f32.mrb[10].mxu0  ;;  %v1552_v47 = vpop.f32.mrb[10].mxu1 }
 0x163   : > { %v926_v50 = vmax.f32 %v894_v40, 0.0  ;;  %v942_v51 = vmax.f32 %v910_v41, 0.0  ;;  %v1505_v52 = vpop.f32.mrb[11].mxu0  ;;  %v1553_v53 = vpop.f32.mrb[11].mxu1 }
 0x164   : > { %v856_v54 = vmul.f32 %v1503_v44, %v2110_v59  ;;  %v872_v55 = vmul.f32 %v1551_v45, %v2110_v59  ;;  %v1506_v56 = vadd.f32 %v1505_v52, %v1504_v46  ;;  %v1554_v57 = vadd.f32 %v1553_v53, %v1552_v47 }
 0x165   : > { %v1386_v58 = vpack.c.bf16 %v926_v50, %v925_v48  ;;  %v1426_v60 = vpack.c.bf16 %v942_v51, %v941_v49 }
 0x166   : > { %v895_v61 = vadd.f32 %v2115_v1, %v856_v54  ;;  %v911_v62 = vadd.f32 %v2115_v1, %v872_v55  ;;  %v857_v63 = vmul.f32 %v1506_v56, %v2110_v59  ;;  %v873_v0 = vmul.f32 %v1554_v57, %v2110_v59 }
 0x167   : > { %1458 = vst [vmem:[%s2128_s22 + $0x8] sm:$0xff] %v1386_v58   ;;  %1466 = vst [vmem:[%s2128_s22 + $0x48] sm:$0xff] %v1426_v60  }
 0x168   : > { %v896_v2 = vadd.f32 %v2115_v1, %v857_v63  ;;  %v912_v3 = vadd.f32 %v2115_v1, %v873_v0  ;;  %v1507_v4 = vpop.f32.mrb[12].mxu0  ;;  %v1555_v5 = vpop.f32.mrb[12].mxu1  ;;  %v927_v6 = vmax.f32 %v895_v61, 0.0  ;;  %v943_v7 = vmax.f32 %v911_v62, 0.0 }
 0x169   : > { %v1508_v8 = vpop.f32.mrb[13].mxu0  ;;  %v1556_v9 = vpop.f32.mrb[13].mxu1 }
 0x16a   : > { %v928_v10 = vmax.f32 %v896_v2, 0.0  ;;  %v944_v11 = vmax.f32 %v912_v3, 0.0  ;;  %v1509_v12 = vadd.f32 %v1508_v8, %v1507_v4  ;;  %v1557_v13 = vadd.f32 %v1556_v9, %v1555_v5  ;;  %v1510_v14 = vpop.f32.mrb[14].mxu0  ;;  %v1558_v15 = vpop.f32.mrb[14].mxu1 }
 0x16b   : > { %v1511_v16 = vpop.f32.mrb[15].mxu0  ;;  %v1559_v17 = vpop.f32.mrb[15].mxu1 }
 0x16c   : > { %v1391_v18 = vpack.c.bf16 %v928_v10, %v927_v6  ;;  %v1431_v19 = vpack.c.bf16 %v944_v11, %v943_v7  ;;  %v858_v20 = vmul.f32 %v1509_v12, %v2110_v59  ;;  %v874_v21 = vmul.f32 %v1557_v13, %v2110_v59 }
 0x16d   : > { %v1512_v22 = vadd.f32 %v1511_v16, %v1510_v14  ;;  %v1560_v23 = vadd.f32 %v1559_v17, %v1558_v15 }
 0x16e   : > { %1459 = vst [vmem:[%s2128_s22 + $0x10] sm:$0xff] %v1391_v18   ;;  %1467 = vst [vmem:[%s2128_s22 + $0x50] sm:$0xff] %v1431_v19   ;;  %v897_v24 = vadd.f32 %v2115_v1, %v858_v20  ;;  %v913_v25 = vadd.f32 %v2115_v1, %v874_v21 }
 0x16f   : > { %v859_v26 = vmul.f32 %v1512_v22, %v2110_v59  ;;  %v875_v27 = vmul.f32 %v1560_v23, %v2110_v59 }
 0x170   : > { %v1513_v28 = vpop.f32.mrb[16].mxu0  ;;  %v1561_v29 = vpop.f32.mrb[16].mxu1  ;;  %v929_v38 = vmax.f32 %v897_v24, 0.0  ;;  %v945_v39 = vmax.f32 %v913_v25, 0.0 }
 0x171   : > { %v898_v30 = vadd.f32 %v2115_v1, %v859_v26  ;;  %v914_v31 = vadd.f32 %v2115_v1, %v875_v27  ;;  %v1514_v32 = vpop.f32.mrb[17].mxu0  ;;  %v1562_v33 = vpop.f32.mrb[17].mxu1 }
 0x172   : > { %v1515_v34 = vadd.f32 %v1514_v32, %v1513_v28  ;;  %v1563_v35 = vadd.f32 %v1562_v33, %v1561_v29  ;;  %v1516_v36 = vpop.f32.mrb[18].mxu0  ;;  %v1564_v37 = vpop.f32.mrb[18].mxu1 }
 0x173   : > { %v930_v40 = vmax.f32 %v898_v30, 0.0  ;;  %v946_v41 = vmax.f32 %v914_v31, 0.0  ;;  %v1517_v42 = vpop.f32.mrb[19].mxu0  ;;  %v1565_v43 = vpop.f32.mrb[19].mxu1 }
 0x174   : > { %v860_v44 = vmul.f32 %v1515_v34, %v2110_v59  ;;  %v876_v45 = vmul.f32 %v1563_v35, %v2110_v59  ;;  %v1518_v46 = vadd.f32 %v1517_v42, %v1516_v36  ;;  %v1566_v47 = vadd.f32 %v1565_v43, %v1564_v37 }
 0x175   : > { %v1396_v48 = vpack.c.bf16 %v930_v40, %v929_v38  ;;  %v1436_v49 = vpack.c.bf16 %v946_v41, %v945_v39 }
 0x176   : > { %v899_v50 = vadd.f32 %v2115_v1, %v860_v44  ;;  %v915_v51 = vadd.f32 %v2115_v1, %v876_v45  ;;  %v861_v52 = vmul.f32 %v1518_v46, %v2110_v59  ;;  %v877_v53 = vmul.f32 %v1566_v47, %v2110_v59 }
 0x177   : > { %1460 = vst [vmem:[%s2128_s22 + $0x18] sm:$0xff] %v1396_v48   ;;  %1468 = vst [vmem:[%s2128_s22 + $0x58] sm:$0xff] %v1436_v49  }
 0x178   : > { %v900_v54 = vadd.f32 %v2115_v1, %v861_v52  ;;  %v916_v55 = vadd.f32 %v2115_v1, %v877_v53  ;;  %v1519_v56 = vpop.f32.mrb[20].mxu0  ;;  %v1567_v57 = vpop.f32.mrb[20].mxu1  ;;  %v931_v58 = vmax.f32 %v899_v50, 0.0  ;;  %v947_v60 = vmax.f32 %v915_v51, 0.0 }
 0x179   : > { %v1520_v61 = vpop.f32.mrb[21].mxu0  ;;  %v1568_v62 = vpop.f32.mrb[21].mxu1 }
 0x17a   : > { %v932_v63 = vmax.f32 %v900_v54, 0.0  ;;  %v948_v0 = vmax.f32 %v916_v55, 0.0  ;;  %v1521_v2 = vadd.f32 %v1520_v61, %v1519_v56  ;;  %v1569_v3 = vadd.f32 %v1568_v62, %v1567_v57  ;;  %v1522_v4 = vpop.f32.mrb[22].mxu0  ;;  %v1570_v5 = vpop.f32.mrb[22].mxu1 }
 0x17b   : > { %v1523_v6 = vpop.f32.mrb[23].mxu0  ;;  %v1571_v7 = vpop.f32.mrb[23].mxu1 }
 0x17c   : > { %v1401_v8 = vpack.c.bf16 %v932_v63, %v931_v58  ;;  %v1441_v9 = vpack.c.bf16 %v948_v0, %v947_v60  ;;  %v862_v10 = vmul.f32 %v1521_v2, %v2110_v59  ;;  %v878_v11 = vmul.f32 %v1569_v3, %v2110_v59 }
 0x17d   : > { %v1524_v12 = vadd.f32 %v1523_v6, %v1522_v4  ;;  %v1572_v13 = vadd.f32 %v1571_v7, %v1570_v5 }
 0x17e   : > { %1461 = vst [vmem:[%s2128_s22 + $0x20] sm:$0xff] %v1401_v8   ;;  %1469 = vst [vmem:[%s2128_s22 + $0x60] sm:$0xff] %v1441_v9   ;;  %v901_v14 = vadd.f32 %v2115_v1, %v862_v10  ;;  %v917_v15 = vadd.f32 %v2115_v1, %v878_v11 }
 0x17f   : > { %v863_v16 = vmul.f32 %v1524_v12, %v2110_v59  ;;  %v879_v17 = vmul.f32 %v1572_v13, %v2110_v59 }
 0x180   : > { %v1525_v18 = vpop.f32.mrb[24].mxu0  ;;  %v1573_v19 = vpop.f32.mrb[24].mxu1  ;;  %v933_v28 = vmax.f32 %v901_v14, 0.0  ;;  %v949_v29 = vmax.f32 %v917_v15, 0.0 }
 0x181   : > { %v902_v20 = vadd.f32 %v2115_v1, %v863_v16  ;;  %v918_v21 = vadd.f32 %v2115_v1, %v879_v17  ;;  %v1526_v22 = vpop.f32.mrb[25].mxu0  ;;  %v1574_v23 = vpop.f32.mrb[25].mxu1 }
 0x182   : > { %v1527_v24 = vadd.f32 %v1526_v22, %v1525_v18  ;;  %v1575_v25 = vadd.f32 %v1574_v23, %v1573_v19  ;;  %v1528_v26 = vpop.f32.mrb[26].mxu0  ;;  %v1576_v27 = vpop.f32.mrb[26].mxu1 }
 0x183   : > { %v934_v30 = vmax.f32 %v902_v20, 0.0  ;;  %v950_v31 = vmax.f32 %v918_v21, 0.0  ;;  %v1529_v32 = vpop.f32.mrb[27].mxu0  ;;  %v1577_v33 = vpop.f32.mrb[27].mxu1 }
 0x184   : > { %v864_v34 = vmul.f32 %v1527_v24, %v2110_v59  ;;  %v880_v35 = vmul.f32 %v1575_v25, %v2110_v59  ;;  %v1530_v36 = vadd.f32 %v1529_v32, %v1528_v26  ;;  %v1578_v37 = vadd.f32 %v1577_v33, %v1576_v27 }
 0x185   : > { %v1406_v38 = vpack.c.bf16 %v934_v30, %v933_v28  ;;  %v1446_v39 = vpack.c.bf16 %v950_v31, %v949_v29 }
 0x186   : > { %v903_v40 = vadd.f32 %v2115_v1, %v864_v34  ;;  %v919_v41 = vadd.f32 %v2115_v1, %v880_v35  ;;  %v865_v42 = vmul.f32 %v1530_v36, %v2110_v59  ;;  %v881_v43 = vmul.f32 %v1578_v37, %v2110_v59 }
 0x187   : > { %1462 = vst [vmem:[%s2128_s22 + $0x28] sm:$0xff] %v1406_v38   ;;  %1470 = vst [vmem:[%s2128_s22 + $0x68] sm:$0xff] %v1446_v39  }
 0x188   : > { %v904_v44 = vadd.f32 %v2115_v1, %v865_v42  ;;  %v920_v45 = vadd.f32 %v2115_v1, %v881_v43  ;;  %v1531_v46 = vpop.f32.mrb[28].mxu0  ;;  %v1579_v47 = vpop.f32.mrb[28].mxu1  ;;  %v935_v48 = vmax.f32 %v903_v40, 0.0  ;;  %v951_v49 = vmax.f32 %v919_v41, 0.0 }
 0x189   : > { %v1532_v50 = vpop.f32.mrb[29].mxu0  ;;  %v1580_v51 = vpop.f32.mrb[29].mxu1 }
 0x18a   : > { %v936_v52 = vmax.f32 %v904_v44, 0.0  ;;  %v952_v53 = vmax.f32 %v920_v45, 0.0  ;;  %v1533_v54 = vadd.f32 %v1532_v50, %v1531_v46  ;;  %v1581_v55 = vadd.f32 %v1580_v51, %v1579_v47  ;;  %v1534_v56 = vpop.f32.mrb[30].mxu0  ;;  %v1582_v57 = vpop.f32.mrb[30].mxu1 }
 0x18b   : > { %v1535_v58 = vpop.f32.mrb[31].mxu0  ;;  %v1583_v60 = vpop.f32.mrb[31].mxu1 }
 0x18c   : > { %v1411_v61 = vpack.c.bf16 %v936_v52, %v935_v48  ;;  %v1451_v62 = vpack.c.bf16 %v952_v53, %v951_v49  ;;  %v866_v63 = vmul.f32 %v1533_v54, %v2110_v59  ;;  %v882_v0 = vmul.f32 %v1581_v55, %v2110_v59 }
 0x18d   : > { %v1536_v2 = vadd.f32 %v1535_v58, %v1534_v56  ;;  %v1584_v3 = vadd.f32 %v1583_v60, %v1582_v57 }
 0x18e   : > { %1463 = vst [vmem:[%s2128_s22 + $0x30] sm:$0xff] %v1411_v61   ;;  %1471 = vst [vmem:[%s2128_s22 + $0x70] sm:$0xff] %v1451_v62   ;;  %v905_v4 = vadd.f32 %v2115_v1, %v866_v63  ;;  %v921_v5 = vadd.f32 %v2115_v1, %v882_v0 }
 0x18f   : > { %v867_v6 = vmul.f32 %v1536_v2, %v2110_v59  ;;  %v883_v7 = vmul.f32 %v1584_v3, %v2110_v59 }
 0x190   : > { %v937_v10 = vmax.f32 %v905_v4, 0.0  ;;  %v953_v11 = vmax.f32 %v921_v5, 0.0 }
 0x191   : > { %v906_v8 = vadd.f32 %v2115_v1, %v867_v6  ;;  %v922_v9 = vadd.f32 %v2115_v1, %v883_v7 }
 0x193   : > { %v938_v12 = vmax.f32 %v906_v8, 0.0  ;;  %v954_v13 = vmax.f32 %v922_v9, 0.0 }
 0x195   : > { %v1416_v59 = vpack.c.bf16 %v938_v12, %v937_v10  ;;  %v1456_v14 = vpack.c.bf16 %v954_v13, %v953_v11 }
 0x197   : > { %1464 = vst [vmem:[%s2128_s22 + $0x38] sm:$0xff] %v1416_v59   ;;  %1472 = vst [vmem:[%s2128_s22 + $0x78] sm:$0xff] %v1456_v14  }
 0x198   : > { %1797 = shalt.err (!%p1794_p5)
}
 0x199   : > { %s1798_s23 = scalar_lea.hbm %s2203_s11, 2048  ;;  %s1802_s14 = scalar_lea.hbm %s2259_s4, 16384 }
 0x19a   : > { %p1799_p9 = scmp.ne.s32.totalorder %s2203_s11, %s1798_s23  ;;  %p1803_p3 = scmp.lt.u32.totalorder %s2203_s11, %s2259_s4 }
 0x19b   : > { %p1804_p7 = scmp.lt.u32.totalorder %s1802_s14, %s1798_s23  ;;  %p1806_p4 = scmp.lt.u32.totalorder %s1798_s23, %s2203_s11 }
 0x19c   : > { %p1800_p1 = pnand %p1799_p9, %p2002_p11 }
 0x19d   : > { %p1805_p13 = por %p1804_p7, %p1803_p3 }
 0x19e   : > { %p1801_p2 = pneg %p1800_p1 }
 0x19f   : > { %p1807_p6 = por %p1806_p4, %p1805_p13 }
 0x1a1   : > { %p1808_p8 = pnand %p1807_p6, %p1801_p2 }
 0x1a3   : > { %1811 = shalt.err (!%p1808_p8)
}
 0x1a4   : > { %s1877_s28 = smov 64   ;;  %s1878_s6 = smov 4  }
 0x1a5   : > { %1607 = dma.vmem_to_hbm [thread:$0]  (%p2002_p11), %s2205_s8, 2048, %s2203_s11, %s1116_s18, %s1877_s28, %s1877_s28, %s1878_s6  }
 0x1a6 PF: > { %p1624_p12 = scmp.ge.s32.totalorder %s1870_s20, 2  ;;  %s1145_s9 = sand.u32 1, %s1850_s15  }
 0x1a7   : > { %p2277_p10 = scmp.ne.s32.totalorder %s2267_s26, 0  ;;  %s1146_s13 = scalar_lea.sflag [#allocation5], %s1145_s9 }
 0x1a9   : > { %p1618_p0 = pnand %p1624_p12, %p2277_p10 }
 0x1ab   : > { %1845 = dma.done.wait (!%p1618_p0), %s1146_s13, 2048  }
 0x1ac   : > { %1847 = vsyncadd (!%p1618_p0), %s1146_s13, 4294965248  ;;  %s21_s20 = sadd.s32 1, %s1870_s20   ;;  %s2278_s15 = smov %s1854_s16 }
 0x1ad   : > { %p18_p5 = scmp.ge.s32.totalorder %s21_s20, 10   ;;  %s2279_s16 = smov %s1858_s17 }
 0x1ae   : > { %s2280_s17 = smov %s2011_s10  ;;  %s2281_s18 = smov %s1866_s19 }
 0x1af   : > { %s2282_s19 = smov %s2284_s5  ;;  %20 = sbr.rel (!%p18_p5) target bundleno = 7 (0x7), region = 100 }
 0x1b6   :  { %1151 = vsyncpa [#allocation4], 1 }
 0x1b7   :  { %1153 = vsyncpa [#allocation4 + $0x1], 1 }
 0x1b8   :  { %1154 = vsyncpa [#allocation7], 1 }
 0x1b9   :  { %1155 = vsyncpa [#allocation5], 1 }
 0x1ba   :  { %1157 = vsyncpa [#allocation5 + $0x1], 1 }

</bundles_post_ra>
